<compile_context>
chip_gen: v7x
topology: tpu7x:2x2x1
jax: 0.10.0
libtpu: 0.0.40
codegen_flags: <defaults>
</compile_context>

<pallas_src>
import functools

import jax
import jax.numpy as jnp
from jax.experimental import pallas as pl
from jax.experimental.pallas import tpu as pltpu

LANE = 128  # f32/bf16 lane quantum


def _fused_hash_kernel(x_ref, w1_ref, b1_ref, w2_ref, b2_ref, out_ref):
    # Backbone linear: (B, D_in) bf16 @ (D_in, last_node) bf16 -> f32 acc on MXU.
    feat = jnp.dot(x_ref[...], w1_ref[...], preferred_element_type=jnp.float32)
    feat = feat + b1_ref[...]            # (1, ln) row broadcast, happens once (no loop)
    # hash_layer: ReLU (f32, VPU) -> Linear (bf16 MXU, f32 acc) -> Tanh (f32, EUP)
    h = jnp.maximum(feat, 0.0)
    y = jnp.dot(h.astype(jnp.bfloat16), w2_ref[...],
                preferred_element_type=jnp.float32) + b2_ref[...]
    out_ref[...] = jnp.tanh(y)


def prepare_params(w1, b1, w2, b2):
    """One-time parameter preprocessing (hoisted out of the per-call path).

    w1: (D_in, last_node), w2: (last_node, code_length), b1: (last_node,), b2: (code_length,).
    """
    last_node = w1.shape[1]
    code_length = w2.shape[1]
    cl_pad = ((code_length + LANE - 1) // LANE) * LANE

    # Dominant operand at its natural width (64 KiB bf16 instead of 256 KiB padded).
    w1_k = w1.astype(jnp.bfloat16)                        # (D_in, last_node)
    b1_k = b1.astype(jnp.float32).reshape(1, last_node)   # single row, broadcast in-kernel

    # Only the output-facing operands are lane-padded to 128 so the result writeback
    # is unmasked / lane-dense.  Padding is exact: padded w2 columns are 0 and padded
    # b2 entries are 0, so padded output columns are tanh(0) = 0 and get sliced off.
    w2_k = jnp.zeros((last_node, cl_pad), jnp.bfloat16).at[:, :code_length].set(
        w2.astype(jnp.bfloat16))
    b2_k = jnp.zeros((1, cl_pad), jnp.float32).at[:, :code_length].set(
        b2.astype(jnp.float32).reshape(1, code_length))
    return w1_k, b1_k, w2_k, b2_k


@functools.partial(jax.jit, static_argnames=("code_length",))
def model_wrapper_forward(x_nchw, w1_k, b1_k, w2_k, b2_k, *, code_length):
    """x_nchw: (B, C, H, W) float32.  Returns (B, code_length) float32."""
    B = x_nchw.shape[0]
    d_in = x_nchw.shape[1] * x_nchw.shape[2] * x_nchw.shape[3]
    last_node = w1_k.shape[1]
    cl_pad = w2_k.shape[1]

    # Row-major NCHW flatten, exactly like torch's x.view(B, -1); cast to bf16 for the
    # MXU.  No batch padding: the full-array VMEM block is exempt from the (8,128)
    # rule and Mosaic masks the unused sublanes (free at this latency-bound size).
    x2d = x_nchw.reshape(B, d_in).astype(jnp.bfloat16)

    flops = 2 * B * d_in * last_node + 2 * B * last_node * cl_pad
    bytes_accessed = (x2d.size * 2 + w1_k.size * 2 + b1_k.size * 4 +
                      w2_k.size * 2 + b2_k.size * 4 + B * cl_pad * 4)

    vmem = pltpu.MemorySpace.VMEM
    out_p = pl.pallas_call(
        _fused_hash_kernel,
        out_shape=jax.ShapeDtypeStruct((B, cl_pad), jnp.float32),
        in_specs=[pl.BlockSpec(memory_space=vmem)] * 5,
        out_specs=pl.BlockSpec(memory_space=vmem),
        cost_estimate=pl.CostEstimate(
            flops=flops,
            transcendentals=B * cl_pad,
            bytes_accessed=bytes_accessed),
    )(x2d, w1_k, b1_k, w2_k, b2_k)

    return out_p[:, :code_length]


def _reference_matched(x_nchw, w1, b1, w2, b2):
    """Matches the kernel's precision choices: bf16 MXU operands, f32 accumulation."""
    B = x_nchw.shape[0]
    x2d = x_nchw.reshape(B, -1).astype(jnp.bfloat16)
    feat = jnp.dot(x2d, w1.astype(jnp.bfloat16),
                   preferred_element_type=jnp.float32) + b1.astype(jnp.float32)
    h = jnp.maximum(feat, 0.0)
    y = jnp.dot(h.astype(jnp.bfloat16), w2.astype(jnp.bfloat16),
                preferred_element_type=jnp.float32) + b2.astype(jnp.float32)
    return jnp.tanh(y)


def _reference_f32(x_nchw, w1, b1, w2, b2):
    """All-f32 reference matching the original PyTorch ModelWrapper semantics."""
    B = x_nchw.shape[0]
    feat = jnp.dot(x_nchw.reshape(B, -1), w1) + b1
    h = jnp.maximum(feat, 0.0)
    return jnp.tanh(jnp.dot(h, w2) + b2)


if __name__ == "__main__":
    # Small shapes consistent with the module's forward:
    #   x: (B=2, C=4, H=16, W=16)  ->  D_in = 1024
    #   last_node = 32, code_length = 16
    B, C, H, W = 2, 4, 16, 16
    D_IN = C * H * W
    LAST_NODE = 32
    CODE_LENGTH = 16

    key = jax.random.PRNGKey(0)
    kx, kw1, kb1, kw2, kb2 = jax.random.split(key, 5)

    x = jax.random.normal(kx, (B, C, H, W), dtype=jnp.float32)

    # Deterministic parameter init (mimics torch.nn.Linear uniform bounds).
    bound1 = 1.0 / (D_IN ** 0.5)
    w1 = jax.random.uniform(kw1, (D_IN, LAST_NODE), jnp.float32, -bound1, bound1)
    b1 = jax.random.uniform(kb1, (LAST_NODE,), jnp.float32, -bound1, bound1)
    bound2 = 1.0 / (LAST_NODE ** 0.5)
    w2 = jax.random.uniform(kw2, (LAST_NODE, CODE_LENGTH), jnp.float32, -bound2, bound2)
    b2 = jax.random.uniform(kb2, (CODE_LENGTH,), jnp.float32, -bound2, bound2)

    # One-time (init-time) parameter preparation — not part of the per-call path.
    params = prepare_params(w1, b1, w2, b2)
    params = tuple(jax.block_until_ready(p) for p in params)

    y = model_wrapper_forward(x, *params, code_length=CODE_LENGTH)
    jax.block_until_ready(y)
    assert y.shape == (B, CODE_LENGTH)

    # Precision-matched reference (bf16 MXU operands, f32 accumulation/activations).
    y_ref = _reference_matched(x, w1, b1, w2, b2)
    assert jnp.allclose(y, y_ref, atol=1e-3, rtol=1e-3), "mismatch vs matched reference"

    # Fidelity to the original all-f32 PyTorch module (bf16 MXU inputs bound the error).
    y_f32 = _reference_f32(x, w1, b1, w2, b2)
    assert jnp.allclose(y, y_f32, atol=2e-2, rtol=2e-2), "mismatch vs f32 module reference"

    print("KERNEL_OK")
</pallas_src>

<mosaic_0001>
module attributes {stable_mosaic.version = 11 : i64} {
  func.func @_fused_hash_kernel(%arg0: memref<2x1024xbf16, #tpu.memory_space<vmem>>, %arg1: memref<1024x32xbf16, #tpu.memory_space<vmem>>, %arg2: memref<1x32xf32, #tpu.memory_space<vmem>>, %arg3: memref<32x128xbf16, #tpu.memory_space<vmem>>, %arg4: memref<1x128xf32, #tpu.memory_space<vmem>>, %arg5: memref<2x128xf32, #tpu.memory_space<vmem>>) attributes {dimension_semantics = [], scalar_prefetch = 0 : i64, scratch_operands = 0 : i64, tpu.core_type = #tpu.core_type<tc>} {
    %c0 = arith.constant 0 : index
    %c0_0 = arith.constant 0 : index
    %0 = vector.load %arg0[%c0, %c0_0] : memref<2x1024xbf16, #tpu.memory_space<vmem>>, vector<2x1024xbf16>
    %c0_1 = arith.constant 0 : index
    %c0_2 = arith.constant 0 : index
    %1 = vector.load %arg1[%c0_1, %c0_2] : memref<1024x32xbf16, #tpu.memory_space<vmem>>, vector<1024x32xbf16>
    %cst = arith.constant dense<0.000000e+00> : vector<2x32xf32>
    %2 = tpu.matmul %0, %1, %cst {dimension_numbers = #tpu.dot_dimension_numbers<[1], [0], [0], [1], [0, 0, 1, 1], [], []>} : vector<2x1024xbf16>, vector<1024x32xbf16>, vector<2x32xf32> -> vector<2x32xf32>
    %c0_3 = arith.constant 0 : index
    %c0_4 = arith.constant 0 : index
    %3 = vector.load %arg2[%c0_3, %c0_4] : memref<1x32xf32, #tpu.memory_space<vmem>>, vector<1x32xf32>
    %4 = vector.broadcast %3 : vector<1x32xf32> to vector<2x32xf32>
    %5 = arith.addf %2, %4 : vector<2x32xf32>
    %cst_5 = arith.constant 0.000000e+00 : f32
    %6 = vector.broadcast %cst_5 : f32 to vector<2x32xf32>
    %7 = arith.maximumf %5, %6 : vector<2x32xf32>
    %8 = arith.truncf %7 : vector<2x32xf32> to vector<2x32xbf16>
    %c0_6 = arith.constant 0 : index
    %c0_7 = arith.constant 0 : index
    %9 = vector.load %arg3[%c0_6, %c0_7] : memref<32x128xbf16, #tpu.memory_space<vmem>>, vector<32x128xbf16>
    %cst_8 = arith.constant dense<0.000000e+00> : vector<2x128xf32>
    %10 = tpu.matmul %8, %9, %cst_8 {dimension_numbers = #tpu.dot_dimension_numbers<[1], [0], [0], [1], [0, 0, 1, 1], [], []>} : vector<2x32xbf16>, vector<32x128xbf16>, vector<2x128xf32> -> vector<2x128xf32>
    %c0_9 = arith.constant 0 : index
    %c0_10 = arith.constant 0 : index
    %11 = vector.load %arg4[%c0_9, %c0_10] : memref<1x128xf32, #tpu.memory_space<vmem>>, vector<1x128xf32>
    %12 = vector.broadcast %11 : vector<1x128xf32> to vector<2x128xf32>
    %13 = arith.addf %10, %12 : vector<2x128xf32>
    %14 = math.tanh %13 : vector<2x128xf32>
    %c0_11 = arith.constant 0 : index
    %c0_12 = arith.constant 0 : index
    %15 = vector.load %arg5[%c0_11, %c0_12] : memref<2x128xf32, #tpu.memory_space<vmem>>, vector<2x128xf32>
    tpu.vector_store %arg5[%c0_11, %c0_12], %14 {strides = array<i32>} : memref<2x128xf32, #tpu.memory_space<vmem>>, vector<2x128xf32>,
    return
  }
}

</mosaic_0001>

<bundles_post_ra>
// kernel: model_wrapper_forward.1
= control target key start
LH: loop header
LB: loop body
LE: loop exit
PB: predicated region body
PF: predicated region fallthrough
CT: control target
= control target key end

     0   :  { %v163_v28 = vlaneseq  ;;  %v1110_v36 = vmov 1966171168   ;;  %s1376_s0 = inlined_call_operand.vmem [shape: bf16[2,1024], index: 0, kind: input, shape index: {}]   ;;  %s1377_s1 = inlined_call_operand.vmem [shape: bf16[1024,32], index: 1, kind: input, shape index: {}]   ;;  %s1378_s2 = inlined_call_operand.vmem [shape: f32[1,32], index: 2, kind: input, shape index: {}]   ;;  %s1379_s3 = inlined_call_operand.vmem [shape: bf16[32,128], index: 3, kind: input, shape index: {}]   ;;  %s1380_s4 = inlined_call_operand.vmem [shape: f32[1,128], index: 4, kind: input, shape index: {}]   ;;  %s1381_s5 = inlined_call_operand.hbm [shape: f32[2,128], index: 5, kind: output, shape index: {}]  }
   0x1   :  { %v1017_v0 = vld [vmem:[%s1377_s1 + $0x40] sm:$0xff]   ;;  %v1021_v4 = vld [vmem:[%s1377_s1 + $0x48] sm:$0xff]   ;;  %v1025_v8 = vld [vmem:[%s1377_s1 + $0x50] sm:$0xff]   ;;  %v161_v37 = vunpack.c.l.s4 %v1110_v36 }
   0x2   :  { %v1018_v1 = vld [vmem:[%s1377_s1 + $0xc0] sm:$0xff]   ;;  %914 = vmatprep.subr.bf16.mxu0 %v1017_v0  ;;  %v1022_v5 = vld [vmem:[%s1377_s1 + $0xc8] sm:$0xff]   ;;  %v1026_v9 = vld [vmem:[%s1377_s1 + $0xd0] sm:$0xff]   ;;  %v164_v33 = vshrl.u32 %v163_v28, 7 }
   0x3   :  { %v1019_v2 = vld [vmem:[%s1377_s1] sm:$0xff]   ;;  %936 = vmatprep.subr.bf16.mxu1 %v1018_v1  ;;  %v1023_v6 = vld [vmem:[%s1377_s1 + $0x8] sm:$0xff]   ;;  %v1027_v10 = vld [vmem:[%s1377_s1 + $0x10] sm:$0xff]   ;;  %v162_v40 = vunpack.c.0.s8 %v161_v37 }
   0x4   :  { %v1020_v3 = vld [vmem:[%s1377_s1 + $0x80] sm:$0xff]   ;;  %915 = vmatpush3.bf16.msra.mxu0 %v1019_v2  ;;  %v1024_v7 = vld [vmem:[%s1377_s1 + $0x88] sm:$0xff]   ;;  %v1028_v11 = vld [vmem:[%s1377_s1 + $0x90] sm:$0xff]  }
   0x5   :  { %937 = vmatpush3.bf16.msra.mxu1 %v1020_v3  ;;  %916 = vmatprep.subr.bf16.mxu0 %v1021_v4  ;;  %v1029_v12 = vld [vmem:[%s1377_s1 + $0x58] sm:$0xff]   ;;  %v1033_v16 = vld [vmem:[%s1377_s1 + $0x60] sm:$0xff]   ;;  %v1037_v20 = vld [vmem:[%s1377_s1 + $0x68] sm:$0xff]   ;;  %v1249_v41 = vsub.s32 %v162_v40, %v164_v33 }
   0x6   :  { %938 = vmatprep.subr.bf16.mxu1 %v1022_v5  ;;  %v1030_v13 = vld [vmem:[%s1377_s1 + $0xd8] sm:$0xff]   ;;  %v1034_v17 = vld [vmem:[%s1377_s1 + $0xe0] sm:$0xff]   ;;  %v1038_v21 = vld [vmem:[%s1377_s1 + $0xe8] sm:$0xff]  }
   0x7   :  { %v1031_v14 = vld [vmem:[%s1377_s1 + $0x18] sm:$0xff]   ;;  %v1035_v18 = vld [vmem:[%s1377_s1 + $0x20] sm:$0xff]   ;;  %v1039_v22 = vld [vmem:[%s1377_s1 + $0x28] sm:$0xff]  }
   0x8   :  { %917 = vmatpush3.bf16.msra.mxu0 %v1023_v6  ;;  %v1032_v15 = vld [vmem:[%s1377_s1 + $0x98] sm:$0xff]   ;;  %v1036_v19 = vld [vmem:[%s1377_s1 + $0xa0] sm:$0xff]   ;;  %v1040_v23 = vld [vmem:[%s1377_s1 + $0xa8] sm:$0xff]  }
   0x9   :  { %939 = vmatpush3.bf16.msra.mxu1 %v1024_v7  ;;  %918 = vmatprep.subr.bf16.mxu0 %v1025_v8  ;;  %v1041_v24 = vld [vmem:[%s1377_s1 + $0x70] sm:$0xff]   ;;  %v1045_v29 = vld [vmem:[%s1377_s1 + $0x78] sm:$0xff]   ;;  %v22_v34 = vld [vmem:[%s1376_s0] sm:$0xff] }
   0xa   :  { %940 = vmatprep.subr.bf16.mxu1 %v1026_v9  ;;  %v1042_v25 = vld [vmem:[%s1377_s1 + $0xf0] sm:$0xff]   ;;  %v1046_v30 = vld [vmem:[%s1377_s1 + $0xf8] sm:$0xff]   ;;  %v1050_v35 = vld [vmem:[%s1377_s1 + $0x140] sm:$0xff]   ;;  %v159_v39 = vcombine.high %v22_v34, %v22_v34  ;;  %v166_v42 = vrot.slane %v22_v34, %v1249_v41 }
   0xb   :  { %v1043_v26 = vld [vmem:[%s1377_s1 + $0x30] sm:$0xff]   ;;  %v1047_v31 = vld [vmem:[%s1377_s1 + $0x38] sm:$0xff]   ;;  %v1051_v38 = vld [vmem:[%s1377_s1 + $0x1c0] sm:$0xff]  }
   0xc   :  { %919 = vmatpush3.bf16.msra.mxu0 %v1027_v10  ;;  %v1044_v27 = vld [vmem:[%s1377_s1 + $0xb0] sm:$0xff]   ;;  %v1048_v32 = vld [vmem:[%s1377_s1 + $0xb8] sm:$0xff]   ;;  %v1253_v43 = vrot.slane %v159_v39, %v1249_v41  ;;  %v174_v44 = vcombine.high %v166_v42, %v166_v42  ;;  %v182_v45 = vrot.slane %v166_v42, %v1249_v41  ;;  %v1052_v47 = vld [vmem:[%s1377_s1 + $0x100] sm:$0xff]  }
   0xd   :  { %941 = vmatpush3.bf16.msra.mxu1 %v1028_v11  ;;  %920 = vmatprep.subr.bf16.mxu0 %v1029_v12  ;;  %v1053_v49 = vld [vmem:[%s1377_s1 + $0x180] sm:$0xff]   ;;  %v1054_v52 = vld [vmem:[%s1377_s1 + $0x148] sm:$0xff]   ;;  %v1058_v58 = vld [vmem:[%s1377_s1 + $0x150] sm:$0xff]  }
   0xe   :  { %942 = vmatprep.subr.bf16.mxu1 %v1030_v13  ;;  %v175_v46 = vcombine.high %v1253_v43, %v1253_v43  ;;  %v196_v48 = vrot.slane %v174_v44, %v1249_v41  ;;  %v204_v51 = vcombine.high %v182_v45, %v182_v45  ;;  %v1055_v54 = vld [vmem:[%s1377_s1 + $0x1c8] sm:$0xff]   ;;  %v1059_v59 = vld [vmem:[%s1377_s1 + $0x1d0] sm:$0xff]   ;;  %v1062_v62 = vld [vmem:[%s1377_s1 + $0x158] sm:$0xff]  }
   0xf   :  { %v1056_v55 = vld [vmem:[%s1377_s1 + $0x108] sm:$0xff]   ;;  %v1060_v60 = vld [vmem:[%s1377_s1 + $0x110] sm:$0xff]   ;;  %v1063_v63 = vld [vmem:[%s1377_s1 + $0x1d8] sm:$0xff]  }
  0x10   :  { %921 = vmatpush3.bf16.msra.mxu0 %v1031_v14  ;;  %v203_v50 = vrot.slane %v175_v46, %v1249_v41  ;;  %632 = vmatprep.mubr.bf16.mxu0 %v196_v48  ;;  %v206_v53 = vcombine.high %v196_v48, %v196_v48  ;;  %v1057_v57 = vld [vmem:[%s1377_s1 + $0x188] sm:$0xff]   ;;  %v1061_v61 = vld [vmem:[%s1377_s1 + $0x190] sm:$0xff]   ;;  %v1064_v0 = vld [vmem:[%s1377_s1 + $0x118] sm:$0xff]  }
  0x11   :  { %943 = vmatpush3.bf16.msra.mxu1 %v1032_v15  ;;  %922 = vmatprep.subr.bf16.mxu0 %v1033_v16  ;;  %v1065_v1 = vld [vmem:[%s1377_s1 + $0x198] sm:$0xff]   ;;  %v1066_v2 = vld [vmem:[%s1377_s1 + $0x160] sm:$0xff]   ;;  %v1070_v6 = vld [vmem:[%s1377_s1 + $0x168] sm:$0xff]  }
  0x12   :  { %944 = vmatprep.subr.bf16.mxu1 %v1034_v17  ;;  %v207_v56 = vcombine.high %v203_v50, %v203_v50  ;;  %672 = vmatprep.mubr.bf16.mxu1 %v206_v53  ;;  %v1067_v3 = vld [vmem:[%s1377_s1 + $0x1e0] sm:$0xff]   ;;  %v1071_v7 = vld [vmem:[%s1377_s1 + $0x1e8] sm:$0xff]   ;;  %v1074_v10 = vld [vmem:[%s1377_s1 + $0x170] sm:$0xff]  }
  0x13   :  { %v1068_v4 = vld [vmem:[%s1377_s1 + $0x120] sm:$0xff]   ;;  %v1072_v8 = vld [vmem:[%s1377_s1 + $0x128] sm:$0xff]  }
  0x14   :  { %923 = vmatpush3.bf16.msra.mxu0 %v1035_v18  ;;  %v1069_v5 = vld [vmem:[%s1377_s1 + $0x1a0] sm:$0xff]   ;;  %v1073_v9 = vld [vmem:[%s1377_s1 + $0x1a8] sm:$0xff]  }
  0x15   :  { %945 = vmatpush3.bf16.msra.mxu1 %v1036_v19  ;;  %924 = vmatprep.subr.bf16.mxu0 %v1037_v20 }
  0x16   :  { %946 = vmatprep.subr.bf16.mxu1 %v1038_v21 }
  0x18   :  { %925 = vmatpush3.bf16.msra.mxu0 %v1039_v22 }
  0x19   :  { %947 = vmatpush3.bf16.msra.mxu1 %v1040_v23  ;;  %926 = vmatprep.subr.bf16.mxu0 %v1041_v24 }
  0x1a   :  { %948 = vmatprep.subr.bf16.mxu1 %v1042_v25 }
  0x1c   :  { %927 = vmatpush3.bf16.msra.mxu0 %v1043_v26 }
  0x1d   :  { %949 = vmatpush3.bf16.msra.mxu1 %v1044_v27  ;;  %928 = vmatprep.subr.bf16.mxu0 %v1045_v29 }
  0x1e   :  { %950 = vmatprep.subr.bf16.mxu1 %v1046_v30 }
  0x20   :  { %929 = vmatpush3.bf16.msra.mxu0 %v1047_v31 }
  0x21   :  { %951 = vmatpush3.bf16.msra.mxu1 %v1048_v32  ;;  %958 = vmatprep.subr.bf16.mxu0 %v1050_v35 }
  0x22   :  { %980 = vmatprep.subr.bf16.mxu1 %v1051_v38 }
  0x23   :  { %633 = vmatmul.mubr.bf16.vlgmr.msra.gmra.mrb[0].mxu0 %v182_v45 }
  0x24   :  { %959 = vmatpush3.bf16.msra.mxu0 %v1052_v47  ;;  %673 = vmatmul.mubr.bf16.vlgmr.msra.gmra.mrb[0].mxu1 %v204_v51 }
  0x25   :  { %960 = vmatprep.subr.bf16.mxu0 %v1054_v52  ;;  %981 = vmatpush3.bf16.msra.mxu1 %v1053_v49 }
  0x26   :  { %712 = vmatprep.mubr.bf16.mxu0 %v203_v50  ;;  %982 = vmatprep.subr.bf16.mxu1 %v1055_v54 }
  0x27   :  { %752 = vmatprep.mubr.bf16.mxu1 %v207_v56 }
  0x28   :  { %961 = vmatpush3.bf16.msra.mxu0 %v1056_v55 }
  0x29   :  { %962 = vmatprep.subr.bf16.mxu0 %v1058_v58  ;;  %983 = vmatpush3.bf16.msra.mxu1 %v1057_v57 }
  0x2a   :  { %984 = vmatprep.subr.bf16.mxu1 %v1059_v59 }
  0x2c   :  { %963 = vmatpush3.bf16.msra.mxu0 %v1060_v60 }
  0x2d   :  { %964 = vmatprep.subr.bf16.mxu0 %v1062_v62  ;;  %985 = vmatpush3.bf16.msra.mxu1 %v1061_v61 }
  0x2e   :  { %986 = vmatprep.subr.bf16.mxu1 %v1063_v63 }
  0x30   :  { %965 = vmatpush3.bf16.msra.mxu0 %v1064_v0 }
  0x31   :  { %966 = vmatprep.subr.bf16.mxu0 %v1066_v2  ;;  %987 = vmatpush3.bf16.msra.mxu1 %v1065_v1 }
  0x32   :  { %988 = vmatprep.subr.bf16.mxu1 %v1067_v3 }
  0x34   :  { %967 = vmatpush3.bf16.msra.mxu0 %v1068_v4 }
  0x35   :  { %968 = vmatprep.subr.bf16.mxu0 %v1070_v6  ;;  %989 = vmatpush3.bf16.msra.mxu1 %v1069_v5 }
  0x36   :  { %10 = vsyncpa [#allocation3], 0  ;;  %990 = vmatprep.subr.bf16.mxu1 %v1071_v7  ;;  %v1075_v11 = vld [vmem:[%s1377_s1 + $0x1f0] sm:$0xff]   ;;  %v1078_v13 = vld [vmem:[%s1377_s1 + $0x178] sm:$0xff]   ;;  %v189_v17 = vrot.slane %v1253_v43, %v1249_v41  ;;  %v1111_v21 = vmov 0.0   ;;  %vm1112_vm0 = vmmov 0  }
  0x37   :  { %v1076_v12 = vld [vmem:[%s1377_s1 + $0x130] sm:$0xff]   ;;  %v1079_v15 = vld [vmem:[%s1377_s1 + $0x1f8] sm:$0xff]   ;;  %v1082_v20 = vld [vmem:[%s1379_s3] sm:$0xff]   ;;  %vm785_vm1 = vcmask 261120   ;;  %s1113_s25 = smov [#allocation2]  }
  0x38   :  { %969 = vmatpush3.bf16.msra.mxu0 %v1072_v8  ;;  %v1077_v14 = vld [vmem:[%s1377_s1 + $0x1b0] sm:$0xff]   ;;  %v1080_v16 = vld [vmem:[%s1377_s1 + $0x138] sm:$0xff]   ;;  %v205_v19 = vcombine.high %v189_v17, %v189_v17  ;;  %v1083_v22 = vld [vmem:[%s1379_s3 + $0x8] sm:$0xff]   ;;  %s837_s26 = sshll.u32 %s1113_s25, 4  ;;  %s838_s26 = int_to_ptr.vmem [resolvable:$true] %s837_s26 }
  0x39   :  { %970 = vmatprep.subr.bf16.mxu0 %v1074_v10  ;;  %991 = vmatpush3.bf16.msra.mxu1 %v1073_v9  ;;  %v1081_v18 = vld [vmem:[%s1377_s1 + $0x1b8] sm:$0xff]   ;;  %v845_v24 = vld [vmem:[%s1378_s2] ss:$0 sm:$0xff]  ;;  %s1086_s27 = scalar_lea.vmem %s838_s26, 32  ;;  %p1091_p1 = scmp.lt.s32.totalorder %s838_s26, %s838_s26 }
  0x3a   :  { %992 = vmatprep.subr.bf16.mxu1 %v1075_v11  ;;  %v910_v50 = vld [vmem:[%s1380_s4] ss:$0 sm:$0xff]  ;;  %p1087_p0 = scmp.ne.s32.totalorder %s838_s26, %s1086_s27  ;;  %p1092_p2 = scmp.lt.s32.totalorder %s1086_s27, %s1086_s27 }
  0x3c   :  { %971 = vmatpush3.bf16.msra.mxu0 %v1076_v12  ;;  %p1093_p3 = por %p1092_p2, %p1091_p1 }
  0x3d   :  { %972 = vmatprep.subr.bf16.mxu0 %v1078_v13  ;;  %993 = vmatpush3.bf16.msra.mxu1 %v1077_v14 }
  0x3e   :  { %994 = vmatprep.subr.bf16.mxu1 %v1079_v15  ;;  %p1094_p4 = pnand %p1093_p3, %p1087_p0 }
  0x40   :  { %973 = vmatpush3.bf16.msra.mxu0 %v1080_v16 }
  0x41   :  { %995 = vmatpush3.bf16.msra.mxu1 %v1081_v18  ;;  %1005 = vmatprep.subr.bf16.mxu0 %v1111_v21 }
  0x43   :  { %713 = vmatmul.mubr.bf16.vlgmr.msra.gmra.mrb[4].mxu0 %v189_v17 }
  0x44   :  { %753 = vmatmul.mubr.bf16.vlgmr.msra.gmra.mrb[4].mxu1 %v205_v19  ;;  %1006 = vmatpush3.bf16.msra.mxu0 %v1082_v20 }
  0x45   :  { %1007 = vmatprep.subr.bf16.mxu0 %v1111_v21  ;;  %1009 = vmatprep.mubr.msk.bf16.mxu0 %vm1112_vm0, %v1111_v21 }
  0x48   :  { %1008 = vmatpush3.bf16.msra.mxu0 %v1083_v22 }
  0xf6   :  { %v930_v23 = vpop.f32.mrb[0].mxu0 }
  0xf7   :  { %v931_v25 = vpop.f32.mrb[1].mxu0  ;;  %v952_v26 = vpop.f32.mrb[0].mxu1 }
  0xf8   :  { %v932_v27 = vadd.f32 %v931_v25, %v930_v23  ;;  %v933_v28 = vpop.f32.mrb[2].mxu0  ;;  %v953_v29 = vpop.f32.mrb[1].mxu1 }
  0xf9   :  { %v934_v30 = vpop.f32.mrb[3].mxu0  ;;  %v954_v32 = vadd.f32 %v953_v29, %v952_v26  ;;  %v955_v33 = vpop.f32.mrb[2].mxu1 }
  0xfa   :  { %v635_v31 = vadd.f32 %v932_v27, %v845_v24  ;;  %v956_v34 = vpop.f32.mrb[3].mxu1 }
  0xfc   :  { %v675_v35 = vadd.f32 %v954_v32, %v635_v31 }
 0x116   :  { %v974_v36 = vpop.f32.mrb[4].mxu0 }
 0x117   :  { %v975_v37 = vpop.f32.mrb[5].mxu0  ;;  %v996_v38 = vpop.f32.mrb[4].mxu1 }
 0x118   :  { %v976_v39 = vadd.f32 %v975_v37, %v974_v36  ;;  %v977_v40 = vpop.f32.mrb[6].mxu0  ;;  %v997_v41 = vpop.f32.mrb[5].mxu1 }
 0x119   :  { %v978_v42 = vpop.f32.mrb[7].mxu0  ;;  %v998_v44 = vadd.f32 %v997_v41, %v996_v38  ;;  %v999_v45 = vpop.f32.mrb[6].mxu1 }
 0x11a   :  { %v715_v43 = vadd.f32 %v976_v39, %v675_v35  ;;  %v1000_v46 = vpop.f32.mrb[7].mxu1 }
 0x11c   :  { %v755_v47 = vadd.f32 %v998_v44, %v715_v43 }
 0x11e   :  { %v760_v48 = vmax.f32 %v755_v47, 0.0 }
 0x120   :  { %v761_v49 = vpack.c.bf16 %v760_v48, %v760_v48 }
 0x122   :  { %1010 = vmatmul.mubr.msk.bf16.vlgmr.msra.gmra.mrb[8].mxu0 %vm785_vm1, %v761_v49 }
 0x1f5   :  { %v823_v51 = vpop.f32.mrb[8].mxu0 }
 0x1f6   :  { %v824_v52 = vadd.f32 %v910_v50, %v823_v51  ;;  %v1011_v53 = vpop.f32.mrb[9].mxu0 }
 0x1f7   :  { %v826_v54 = vpop.f32.mrb[10].mxu0 }
 0x1f8   :  { %1084 = vtanh.f32 %v824_v52  ;;  %v1012_v55 = vpop.f32.mrb[11].mxu0 }
 0x202   :  { %v1085_v56 = vpop.eup %1084 }
 0x203   :  { %830 = vst [vmem:[#allocation2] sm:$0x3] %v1085_v56 }
 0x204   :  { %1097 = shalt.err (!%p1094_p4)
}
 0x205   :  { %s1098_s29 = scalar_lea.hbm %s1381_s5, 32 }
 0x206   :  { %p1099_p5 = scmp.ne.s32.totalorder %s1381_s5, %s1098_s29  ;;  %p1102_p6 = scmp.lt.u32.totalorder %s1098_s29, %s1381_s5 }
 0x208   :  { %p1104_p7 = pnand %p1102_p6, %p1099_p5 }
 0x20a   :  { %1107 = shalt.err (!%p1104_p7)
}
 0x20b   :  { %840 = dma.vmem_to_hbm [thread:$0]  %s838_s26, 32, %s1381_s5, [#allocation3]  }
 0x20c   :  { %1108 = dma.done.wait [#allocation3], 32  }
 0x20d   :  { %1109 = vsyncadd [#allocation3], 4294967264 }
 0x20e   :  { %844 = vsyncpa [#allocation3], 1 }

</bundles_post_ra>
